<compile_context>
chip_gen: v7x
topology: tpu7x:2x2x1
jax: 0.10.0
libtpu: 0.0.40
codegen_flags: <defaults>
</compile_context>

<pallas_src>
import jax
import jax.numpy as jnp
from jax import lax
from jax.experimental import pallas as pl
from jax.experimental.pallas import tpu as pltpu

_LANE = 128
_MIN_SPLIT_BYTES = 2 * 1024 * 1024        # below this, a single block is fine


def _tpu_budget():
    """(max_block_bytes per input, vmem_limit_bytes, two_tensorcores)."""
    try:
        vmem = int(pltpu.get_tpu_info().vmem_capacity_bytes)
    except Exception:
        vmem = 128 * 1024 * 1024
    if vmem <= 64 * 1024 * 1024:
        # v7x-class: 64 MiB VMEM per TensorCore, 2 TensorCores per chip.
        return 4 * 1024 * 1024, 48 * 1024 * 1024, True
    # v5e / v6e: 128 MiB VMEM, 1 TensorCore.
    return 8 * 1024 * 1024, 64 * 1024 * 1024, False


def _choose_tiling(B, NR, itemsize, max_block_bytes, two_cores):
    """Pick (R, P, S, nr_main), never padding or copying the inputs.

    The kernel covers chunks [0, nr_main) with a (P, S) grid of (B, R, 128)
    blocks (P is the megacore-parallel axis); the small remainder
    NR - nr_main (< R chunks) is reduced directly in JAX by the caller.
    """
    bytes_per_chunk = B * _LANE * itemsize
    total = NR * bytes_per_chunk
    if NR <= 8 or (total <= max_block_bytes and total <= _MIN_SPLIT_BYTES):
        return NR, 1, 1, NR                     # single full-extent block

    # Target block: <= max_block_bytes and at least ~4 blocks overall so the
    # pipeline (and both v7x TensorCores) have work.
    r_cap = max(8, min(max_block_bytes, total // 4) // bytes_per_chunk // 8 * 8)
    thresh = max(8, r_cap // 2)                 # "big enough" block, in chunks

    # Exact divisors of NR (multiple of 8, <= r_cap): no JAX tail at all.
    best = best_even = 0
    for R in range(8, min(r_cap, NR) + 1, 8):
        if NR % R == 0:
            best = R
            if (NR // R) % 2 == 0:
                best_even = R
    if best_even >= thresh:                     # big blocks, even count, no tail
        return best_even, 2, (NR // best_even) // 2, NR
    if best >= thresh and not two_cores:        # odd block count: fine on 1-TC chips
        return best, 1, NR // best, NR

    # Near-equal multiple-of-8 blocks with an (aimed) even count; the < R-chunk
    # remainder is reduced in JAX -- never padded.
    nb = -(-NR // r_cap)                        # ceil
    nb += nb % 2                                # make even (>= 2)
    R = max(8, (NR // nb) // 8 * 8)
    nbf = NR // R
    P = 2 if (nbf >= 2 and nbf % 2 == 0) else 1
    S = nbf // P
    return R, P, S, P * S * R


def _pick_subchunk(R):
    """Sub-chunk size (multiple of 8 dividing R) so the in-kernel f32 upcast
    temporaries stay small while the unrolled accumulation loop has <= 16
    steps. If R is not a multiple of 8 (full-extent tiny block) use R."""
    if R % 8 != 0 or R <= 16:
        return R
    rc = 8
    while rc < R and (R % rc != 0 or R // rc > 16):
        rc += 8
    return rc if R % rc == 0 else R


def _make_kernel(n_sub, rc):
    """Kernel: reduce a (B, R, 128) tile pair into lane-resident partials.

    out_ref block is (1, 4, B, 128), resident across the reduction grid axis:
      plane 0 = sum (d1-d2)^2, plane 1 = sum d1*d2,
      plane 2 = sum d1^2,      plane 3 = sum d2^2.
    The final 128-lane reduction happens in plain JAX.
    """

    def accum(d1, d2, sse, dot, n1, n2):
        d1 = d1.astype(jnp.float32)
        d2 = d2.astype(jnp.float32)
        diff = d1 - d2
        return (sse + jnp.sum(diff * diff, axis=1),
                dot + jnp.sum(d1 * d2, axis=1),
                n1 + jnp.sum(d1 * d1, axis=1),
                n2 + jnp.sum(d2 * d2, axis=1))

    def kernel(d1_ref, d2_ref, out_ref):
        @pl.when(pl.program_id(1) == 0)
        def _():
            out_ref[...] = jnp.zeros_like(out_ref)

        B = d1_ref.shape[0]
        zero = jnp.zeros((B, _LANE), jnp.float32)

        if n_sub == 1:
            sse, dot, n1, n2 = accum(d1_ref[...], d2_ref[...],
                                     zero, zero, zero, zero)
        else:
            # Sub-chunked pass over the R axis: bounds f32 upcast temporaries
            # and keeps the four (B, 128) accumulators in vregs.
            def body(c, carry):
                i = pl.multiple_of(c * rc, 8)
                return accum(d1_ref[:, pl.ds(i, rc), :],
                             d2_ref[:, pl.ds(i, rc), :], *carry)

            sse, dot, n1, n2 = lax.fori_loop(
                0, n_sub, body, (zero, zero, zero, zero), unroll=True)

        out_ref[0, 0] += sse
        out_ref[0, 1] += dot
        out_ref[0, 2] += n1
        out_ref[0, 3] += n2

    return kernel


def _pair_stats(d1_flat, d2_flat, *, max_block_bytes=None, vmem_limit_bytes=None):
    """Per-sample (sse, dot, |d1|^2, |d2|^2) in f32 for (B, D) descriptors."""
    B, D = d1_flat.shape
    auto_block, auto_vmem, two_cores = _tpu_budget()
    max_block_bytes = auto_block if max_block_bytes is None else max_block_bytes
    vmem_limit_bytes = auto_vmem if vmem_limit_bytes is None else vmem_limit_bytes

    NR = D // _LANE
    d_main = NR * _LANE
    itemsize = jnp.dtype(d1_flat.dtype).itemsize

    sse = jnp.zeros((B,), jnp.float32)
    dot = jnp.zeros((B,), jnp.float32)
    n1 = jnp.zeros((B,), jnp.float32)
    n2 = jnp.zeros((B,), jnp.float32)

    if NR > 0:
        if d_main == D:
            # Free reshape (contiguous) -- no HBM copy.
            d1_3d = d1_flat.reshape(B, NR, _LANE)
            d2_3d = d2_flat.reshape(B, NR, _LANE)
        else:
            # TODO(synk): D not a multiple of 128 materializes this slice once.
            d1_3d = d1_flat[:, :d_main].reshape(B, NR, _LANE)
            d2_3d = d2_flat[:, :d_main].reshape(B, NR, _LANE)

        R, P, S, nr_main = _choose_tiling(B, NR, itemsize, max_block_bytes,
                                          two_cores)
        rc = _pick_subchunk(R)
        kernel = _make_kernel(R // rc, rc)
        in_map = lambda p, k: (0, p * S + k, 0)

        # TODO(synk): for very large B with small D, a grid axis over B would
        # keep per-sample DMA runs long; not needed at typical loss shapes.
        parts = pl.pallas_call(
            kernel,
            out_shape=jax.ShapeDtypeStruct((P, 4, B, _LANE), jnp.float32),
            grid_spec=pltpu.PrefetchScalarGridSpec(
                num_scalar_prefetch=0,
                grid=(P, S),
                in_specs=[
                    pl.BlockSpec((B, R, _LANE), in_map),
                    pl.BlockSpec((B, R, _LANE), in_map),
                ],
                out_specs=pl.BlockSpec((1, 4, B, _LANE),
                                       lambda p, k: (p, 0, 0, 0)),
            ),
            compiler_params=pltpu.CompilerParams(
                dimension_semantics=("parallel", "arbitrary"),
                vmem_limit_bytes=vmem_limit_bytes,
            ),
            cost_estimate=pl.CostEstimate(
                flops=10 * B * nr_main * _LANE,
                transcendentals=0,
                bytes_accessed=2 * B * nr_main * _LANE * itemsize
                + P * 4 * B * _LANE * 4,
            ),
        )(d1_3d, d2_3d)

        sums = jnp.sum(parts, axis=(0, 3))        # (4, B)
        sse, dot, n1, n2 = sums[0], sums[1], sums[2], sums[3]

        if nr_main < NR:
            # Chunk-axis remainder (< one block): reduced in XLA, no pad copy.
            t1 = d1_3d[:, nr_main:, :].astype(jnp.float32)
            t2 = d2_3d[:, nr_main:, :].astype(jnp.float32)
            td = t1 - t2
            sse = sse + jnp.sum(td * td, axis=(1, 2))
            dot = dot + jnp.sum(t1 * t2, axis=(1, 2))
            n1 = n1 + jnp.sum(t1 * t1, axis=(1, 2))
            n2 = n2 + jnp.sum(t2 * t2, axis=(1, 2))

    if d_main < D:
        # Feature-dim remainder (< 128 columns): reduced in XLA.
        t1 = d1_flat[:, d_main:].astype(jnp.float32)
        t2 = d2_flat[:, d_main:].astype(jnp.float32)
        td = t1 - t2
        sse = sse + jnp.sum(td * td, axis=1)
        dot = dot + jnp.sum(t1 * t2, axis=1)
        n1 = n1 + jnp.sum(t1 * t1, axis=1)
        n2 = n2 + jnp.sum(t2 * t2, axis=1)

    return sse, dot, n1, n2


def _run_multiloss_kernel(d1_flat, d2_flat, **kw):
    """Per-sample (mse, cosine) for flattened descriptors of shape (B, D)."""
    _, D = d1_flat.shape
    sse, dot, n1, n2 = _pair_stats(d1_flat, d2_flat, **kw)
    mse = sse / jnp.float32(D)
    eps = jnp.float32(1e-8)
    # Per-norm clamp, matching F.cosine_similarity semantics.
    cos = dot / (jnp.maximum(jnp.sqrt(n1), eps) * jnp.maximum(jnp.sqrt(n2), eps))
    return mse, cos


class MultiLossJax:
    """JAX/Pallas equivalent of MultiLoss (forward only).

    loss_sup   -> per-element MSE over the supervised slice    ('sup_mse')
    loss_unsup -> mean(1 - cosine) over the unsupervised slice ('uns_cos')
    """

    def __init__(self, alpha=0.3, inner_bw=True):
        assert 0 <= alpha
        self.alpha_sup = 1.0
        self.alpha_unsup = float(alpha)
        self.inner_bw = inner_bw
        # TODO(synk): inner_bw / pause_gradient / backward() machinery is
        # PyTorch autograd plumbing with no forward-pass Pallas equivalent.

    def __call__(self, desc1, desc2, homography):
        B = desc1.shape[0]
        # --- split_batch_sup_unsup (glue: only inspects homography[:, 0, 0]) ---
        h00 = homography[:, 0, 0]
        num_finite = jnp.sum(jnp.isfinite(h00)).astype(jnp.int32)
        max_sup = 512 if self.inner_bw else 8
        idx = jnp.arange(B, dtype=jnp.int32)
        sup_mask = (idx < jnp.minimum(num_finite, max_sup)).astype(jnp.float32)
        unsup_mask = (idx >= num_finite).astype(jnp.float32)
        # TODO(synk): the "batch is not properly sorted" asserts are host-side
        # data-validation checks, not expressible as traced JAX/Pallas ops.

        # Keep descriptors in their HBM dtype (e.g. bf16); the kernel upcasts.
        d1_flat = desc1.reshape(B, -1)
        d2_flat = desc2.reshape(B, -1)

        mse, cos = _run_multiloss_kernel(d1_flat, d2_flat)

        # Masked means + alpha combine: O(B), done in plain JAX.
        sup_cnt = jnp.maximum(jnp.sum(sup_mask), jnp.float32(1.0))
        uns_cnt = jnp.maximum(jnp.sum(unsup_mask), jnp.float32(1.0))
        sup_loss = jnp.sum(sup_mask * mse) / sup_cnt
        uns_loss = self.alpha_unsup * (jnp.sum(unsup_mask * (1.0 - cos)) / uns_cnt)
        loss = self.alpha_sup * sup_loss + uns_loss
        return {"loss": loss, "sup_mse": sup_loss, "uns_cos": uns_loss}


if __name__ == "__main__":
    key = jax.random.PRNGKey(0)
    ks = jax.random.split(key, 6)

    def ref_stats(x1, x2):
        x1 = x1.astype(jnp.float32)
        x2 = x2.astype(jnp.float32)
        mse = jnp.mean((x1 - x2) ** 2, axis=-1)
        nn1 = jnp.sqrt(jnp.sum(x1 * x1, -1))
        nn2 = jnp.sqrt(jnp.sum(x2 * x2, -1))
        cos = jnp.sum(x1 * x2, -1) / (jnp.maximum(nn1, 1e-8) * jnp.maximum(nn2, 1e-8))
        return mse, cos

    # --- Case 1: end-to-end MultiLoss on small NCHW descriptors,
    #     half supervised (finite homography) / half unsupervised (NaN). ---
    B, C, H, W = 4, 4, 8, 8                      # C*H*W = 256 -> 2 lane chunks
    desc1 = jax.random.normal(ks[0], (B, C, H, W), dtype=jnp.float32)
    desc2 = jax.random.normal(ks[1], (B, C, H, W), dtype=jnp.float32)
    hom = jnp.concatenate(
        [jnp.tile(jnp.eye(3, dtype=jnp.float32)[None], (2, 1, 1)),
         jnp.full((2, 3, 3), jnp.nan, dtype=jnp.float32)], axis=0)

    model = MultiLossJax(alpha=0.3, inner_bw=True)
    out = model(desc1, desc2, hom)
    out = jax.tree_util.tree_map(jax.block_until_ready, out)

    mse_r, cos_r = ref_stats(desc1.reshape(B, -1), desc2.reshape(B, -1))
    ref_sup = jnp.mean(mse_r[:2])
    ref_uns = 0.3 * jnp.mean(1.0 - cos_r[2:])
    assert jnp.allclose(out["sup_mse"], ref_sup, rtol=1e-5, atol=1e-5)
    assert jnp.allclose(out["uns_cos"], ref_uns, rtol=1e-5, atol=1e-5)
    assert jnp.allclose(out["loss"], ref_sup + ref_uns, rtol=1e-5, atol=1e-5)

    # --- Case 2: bf16 inputs, multi-step grid with the parallel split
    #     (forced small blocks -> R=8, P=2, S=2, accumulation across steps). ---
    B2, D2 = 8, 32 * 128
    x1 = jax.random.normal(ks[2], (B2, D2), dtype=jnp.bfloat16)
    x2 = jax.random.normal(ks[3], (B2, D2), dtype=jnp.bfloat16)
    mse2, cos2 = _run_multiloss_kernel(x1, x2,
                                       max_block_bytes=8 * B2 * _LANE * 2)
    jax.block_until_ready((mse2, cos2))
    mse_r2, cos_r2 = ref_stats(x1, x2)
    assert jnp.allclose(mse2, mse_r2, rtol=1e-4, atol=1e-4)
    assert jnp.allclose(cos2, cos_r2, rtol=1e-4, atol=1e-4)

    # --- Case 3: ragged sizes -> chunk-axis tail and feature-dim tail are
    #     reduced in JAX (no padding, no input copies for the kernel part). ---
    B3, D3 = 4, 9 * 128 + 32
    y1 = jax.random.normal(ks[4], (B3, D3), dtype=jnp.float32)
    y2 = jax.random.normal(ks[5], (B3, D3), dtype=jnp.float32)
    mse3, cos3 = _run_multiloss_kernel(y1, y2,
                                       max_block_bytes=8 * B3 * _LANE * 4)
    jax.block_until_ready((mse3, cos3))
    mse_r3, cos_r3 = ref_stats(y1, y2)
    assert jnp.allclose(mse3, mse_r3, rtol=1e-5, atol=1e-5)
    assert jnp.allclose(cos3, cos_r3, rtol=1e-5, atol=1e-5)

    print("KERNEL_OK")
</pallas_src>

<mosaic_0001>
module attributes {stable_mosaic.version = 11 : i64} {
  func.func @kernel(%arg0: i32, %arg1: i32, %arg2: memref<4x2x128xf32, #tpu.memory_space<vmem>>, %arg3: memref<4x2x128xf32, #tpu.memory_space<vmem>>, %arg4: memref<1x4x4x128xf32, #tpu.memory_space<vmem>>) attributes {dimension_semantics = [#tpu.dimension_semantics<parallel>, #tpu.dimension_semantics<arbitrary>], iteration_bounds = array<i64: 1, 1>, scalar_prefetch = 0 : i64, scratch_operands = 0 : i64, tpu.core_type = #tpu.core_type<tc>, window_params = [{transform_indices = @transform_0, window_bounds = array<i64: 4, 2, 128>}, {transform_indices = @transform_1, window_bounds = array<i64: 4, 2, 128>}, {transform_indices = @transform_2, window_bounds = array<i64: 1, 4, 4, 128>}]} {
    %c0_i32 = arith.constant 0 : i32
    %0 = arith.cmpi eq, %arg1, %c0_i32 : i32
    %1 = arith.extui %0 : i1 to i32
    %c0_i32_0 = arith.constant 0 : i32
    %2 = arith.cmpi ne, %1, %c0_i32_0 : i32
    scf.if %2 {
      %cst_39 = arith.constant 0.000000e+00 : f32
      %43 = vector.broadcast %cst_39 : f32 to vector<1x4x4x128xf32>
      %c0_40 = arith.constant 0 : index
      %c0_41 = arith.constant 0 : index
      %c0_42 = arith.constant 0 : index
      %c0_43 = arith.constant 0 : index
      %44 = vector.load %arg4[%c0_40, %c0_41, %c0_42, %c0_43] : memref<1x4x4x128xf32, #tpu.memory_space<vmem>>, vector<1x4x4x128xf32>
      tpu.vector_store %arg4[%c0_40, %c0_41, %c0_42, %c0_43], %43 {strides = array<i32>} : memref<1x4x4x128xf32, #tpu.memory_space<vmem>>, vector<1x4x4x128xf32>,
    } else {
    }
    %cst = arith.constant 0.000000e+00 : f32
    %3 = vector.broadcast %cst : f32 to vector<4x128xf32>
    %c0 = arith.constant 0 : index
    %c0_1 = arith.constant 0 : index
    %c0_2 = arith.constant 0 : index
    %4 = vector.load %arg2[%c0, %c0_1, %c0_2] : memref<4x2x128xf32, #tpu.memory_space<vmem>>, vector<4x2x128xf32>
    %c0_3 = arith.constant 0 : index
    %c0_4 = arith.constant 0 : index
    %c0_5 = arith.constant 0 : index
    %5 = vector.load %arg3[%c0_3, %c0_4, %c0_5] : memref<4x2x128xf32, #tpu.memory_space<vmem>>, vector<4x2x128xf32>
    %6 = arith.subf %4, %5 : vector<4x2x128xf32>
    %7 = arith.mulf %6, %6 : vector<4x2x128xf32>
    %cst_6 = arith.constant dense<0.000000e+00> : vector<4x128xf32>
    %8 = vector.multi_reduction <add>, %7, %cst_6 [1] : vector<4x2x128xf32> to vector<4x128xf32>
    %9 = arith.addf %3, %8 : vector<4x128xf32>
    %10 = arith.mulf %4, %5 : vector<4x2x128xf32>
    %cst_7 = arith.constant dense<0.000000e+00> : vector<4x128xf32>
    %11 = vector.multi_reduction <add>, %10, %cst_7 [1] : vector<4x2x128xf32> to vector<4x128xf32>
    %12 = arith.addf %3, %11 : vector<4x128xf32>
    %13 = arith.mulf %4, %4 : vector<4x2x128xf32>
    %cst_8 = arith.constant dense<0.000000e+00> : vector<4x128xf32>
    %14 = vector.multi_reduction <add>, %13, %cst_8 [1] : vector<4x2x128xf32> to vector<4x128xf32>
    %15 = arith.addf %3, %14 : vector<4x128xf32>
    %16 = arith.mulf %5, %5 : vector<4x2x128xf32>
    %cst_9 = arith.constant dense<0.000000e+00> : vector<4x128xf32>
    %17 = vector.multi_reduction <add>, %16, %cst_9 [1] : vector<4x2x128xf32> to vector<4x128xf32>
    %18 = arith.addf %3, %17 : vector<4x128xf32>
    %c0_10 = arith.constant 0 : index
    %c0_11 = arith.constant 0 : index
    %c0_12 = arith.constant 0 : index
    %c0_13 = arith.constant 0 : index
    %19 = vector.load %arg4[%c0_10, %c0_11, %c0_12, %c0_13] : memref<1x4x4x128xf32, #tpu.memory_space<vmem>>, vector<1x1x4x128xf32>
    %20 = vector.shape_cast %19 : vector<1x1x4x128xf32> to vector<4x128xf32>
    %21 = arith.addf %20, %9 : vector<4x128xf32>
    %c0_14 = arith.constant 0 : index
    %c0_15 = arith.constant 0 : index
    %c0_16 = arith.constant 0 : index
    %c0_17 = arith.constant 0 : index
    %22 = vector.load %arg4[%c0_14, %c0_15, %c0_16, %c0_17] : memref<1x4x4x128xf32, #tpu.memory_space<vmem>>, vector<1x1x4x128xf32>
    %23 = vector.shape_cast %22 : vector<1x1x4x128xf32> to vector<4x128xf32>
    %24 = vector.shape_cast %21 : vector<4x128xf32> to vector<1x1x4x128xf32>
    tpu.vector_store %arg4[%c0_14, %c0_15, %c0_16, %c0_17], %24 {strides = array<i32>} : memref<1x4x4x128xf32, #tpu.memory_space<vmem>>, vector<1x1x4x128xf32>,
    %c0_18 = arith.constant 0 : index
    %c1 = arith.constant 1 : index
    %c0_19 = arith.constant 0 : index
    %c0_20 = arith.constant 0 : index
    %25 = vector.load %arg4[%c0_18, %c1, %c0_19, %c0_20] : memref<1x4x4x128xf32, #tpu.memory_space<vmem>>, vector<1x1x4x128xf32>
    %26 = vector.shape_cast %25 : vector<1x1x4x128xf32> to vector<4x128xf32>
    %27 = arith.addf %26, %12 : vector<4x128xf32>
    %c0_21 = arith.constant 0 : index
    %c1_22 = arith.constant 1 : index
    %c0_23 = arith.constant 0 : index
    %c0_24 = arith.constant 0 : index
    %28 = vector.load %arg4[%c0_21, %c1_22, %c0_23, %c0_24] : memref<1x4x4x128xf32, #tpu.memory_space<vmem>>, vector<1x1x4x128xf32>
    %29 = vector.shape_cast %28 : vector<1x1x4x128xf32> to vector<4x128xf32>
    %30 = vector.shape_cast %27 : vector<4x128xf32> to vector<1x1x4x128xf32>
    tpu.vector_store %arg4[%c0_21, %c1_22, %c0_23, %c0_24], %30 {strides = array<i32>} : memref<1x4x4x128xf32, #tpu.memory_space<vmem>>, vector<1x1x4x128xf32>,
    %c0_25 = arith.constant 0 : index
    %c2 = arith.constant 2 : index
    %c0_26 = arith.constant 0 : index
    %c0_27 = arith.constant 0 : index
    %31 = vector.load %arg4[%c0_25, %c2, %c0_26, %c0_27] : memref<1x4x4x128xf32, #tpu.memory_space<vmem>>, vector<1x1x4x128xf32>
    %32 = vector.shape_cast %31 : vector<1x1x4x128xf32> to vector<4x128xf32>
    %33 = arith.addf %32, %15 : vector<4x128xf32>
    %c0_28 = arith.constant 0 : index
    %c2_29 = arith.constant 2 : index
    %c0_30 = arith.constant 0 : index
    %c0_31 = arith.constant 0 : index
    %34 = vector.load %arg4[%c0_28, %c2_29, %c0_30, %c0_31] : memref<1x4x4x128xf32, #tpu.memory_space<vmem>>, vector<1x1x4x128xf32>
    %35 = vector.shape_cast %34 : vector<1x1x4x128xf32> to vector<4x128xf32>
    %36 = vector.shape_cast %33 : vector<4x128xf32> to vector<1x1x4x128xf32>
    tpu.vector_store %arg4[%c0_28, %c2_29, %c0_30, %c0_31], %36 {strides = array<i32>} : memref<1x4x4x128xf32, #tpu.memory_space<vmem>>, vector<1x1x4x128xf32>,
    %c0_32 = arith.constant 0 : index
    %c3 = arith.constant 3 : index
    %c0_33 = arith.constant 0 : index
    %c0_34 = arith.constant 0 : index
    %37 = vector.load %arg4[%c0_32, %c3, %c0_33, %c0_34] : memref<1x4x4x128xf32, #tpu.memory_space<vmem>>, vector<1x1x4x128xf32>
    %38 = vector.shape_cast %37 : vector<1x1x4x128xf32> to vector<4x128xf32>
    %39 = arith.addf %38, %18 : vector<4x128xf32>
    %c0_35 = arith.constant 0 : index
    %c3_36 = arith.constant 3 : index
    %c0_37 = arith.constant 0 : index
    %c0_38 = arith.constant 0 : index
    %40 = vector.load %arg4[%c0_35, %c3_36, %c0_37, %c0_38] : memref<1x4x4x128xf32, #tpu.memory_space<vmem>>, vector<1x1x4x128xf32>
    %41 = vector.shape_cast %40 : vector<1x1x4x128xf32> to vector<4x128xf32>
    %42 = vector.shape_cast %39 : vector<4x128xf32> to vector<1x1x4x128xf32>
    tpu.vector_store %arg4[%c0_35, %c3_36, %c0_37, %c0_38], %42 {strides = array<i32>} : memref<1x4x4x128xf32, #tpu.memory_space<vmem>>, vector<1x1x4x128xf32>,
    return
  }
  func.func @transform_0(%arg0: i32, %arg1: i32) -> (i32, i32, i32) {
    %c1_i32 = arith.constant 1 : i32
    %0 = arith.muli %arg0, %c1_i32 : i32
    %1 = arith.addi %0, %arg1 : i32
    %c0_i32 = arith.constant 0 : i32
    %c0_i32_0 = arith.constant 0 : i32
    %c0_i32_1 = arith.constant 0 : i32
    return %c0_i32, %1, %c0_i32_0 : i32, i32, i32
  }
  func.func @transform_1(%arg0: i32, %arg1: i32) -> (i32, i32, i32) {
    %c1_i32 = arith.constant 1 : i32
    %0 = arith.muli %arg0, %c1_i32 : i32
    %1 = arith.addi %0, %arg1 : i32
    %c0_i32 = arith.constant 0 : i32
    %c0_i32_0 = arith.constant 0 : i32
    %c0_i32_1 = arith.constant 0 : i32
    return %c0_i32, %1, %c0_i32_0 : i32, i32, i32
  }
  func.func @transform_2(%arg0: i32, %arg1: i32) -> (i32, i32, i32, i32) {
    %c0_i32 = arith.constant 0 : i32
    %c0_i32_0 = arith.constant 0 : i32
    %c0_i32_1 = arith.constant 0 : i32
    %c0_i32_2 = arith.constant 0 : i32
    return %arg0, %c0_i32, %c0_i32_0, %c0_i32_1 : i32, i32, i32, i32
  }
}

</mosaic_0001>

<bundles_post_ra>
// kernel: tpu_custom_call.1
= control target key start
LH: loop header
LB: loop body
LE: loop exit
PB: predicated region body
PF: predicated region fallthrough
CT: control target
= control target key end

     0   :  { %7 = vsyncpa [#allocation3], 0  ;;  %s487_s0 = inlined_call_operand.hbm [shape: f32[4,2,128], index: 0, kind: input, shape index: {}]   ;;  %s488_s1 = inlined_call_operand.hbm [shape: f32[4,2,128], index: 1, kind: input, shape index: {}]   ;;  %s489_s2 = inlined_call_operand.hbm [shape: f32[1,4,4,128], index: 2, kind: output, shape index: {}]  }
   0x1   :  { %8 = vsyncpa [#allocation6], 0 }
   0x2   :  { %9 = vsyncpa [#allocation4], 0  ;;  %s361_s9 = smov [#allocation2]   ;;  %s289_s13 = scalar_lea.hbm %s487_s0, 128 }
   0x3   :  { %s18_s10 = sshll.u32 %s361_s9, 4  ;;  %p290_p0 = scmp.ne.s32.totalorder %s487_s0, %s289_s13  ;;  %s19_s10 = int_to_ptr.vmem [resolvable:$true] %s18_s10 }
   0x4   :  { %p293_p1 = scmp.lt.u32.totalorder %s289_s13, %s487_s0 }
   0x6   :  { %p295_p2 = pnand %p293_p1, %p290_p0 }
   0x8   :  { %298 = shalt.err (!%p295_p2)
}
   0x9   :  { %s299_s18 = scalar_lea.vmem %s19_s10, 128  ;;  %p304_p4 = scmp.lt.s32.totalorder %s19_s10, %s19_s10 }
   0xa   :  { %p300_p3 = scmp.ne.s32.totalorder %s19_s10, %s299_s18  ;;  %p305_p5 = scmp.lt.s32.totalorder %s299_s18, %s299_s18 }
   0xc   :  { %p306_p6 = por %p305_p5, %p304_p4 }
   0xe   :  { %p307_p7 = pnand %p306_p6, %p300_p3 }
  0x10   :  { %310 = shalt.err (!%p307_p7)
}
  0x11   :  { %s362_s19 = smov 32   ;;  %s363_s20 = smov 2  }
  0x12   :  { %24 = dma.hbm_to_vmem [thread:$0]  %s487_s0, 128, %s19_s10, [#allocation3], %s362_s19, %s362_s19, %s363_s20  }
  0x13   :  { %s364_s23 = smov [#allocation5]   ;;  %s311_s27 = scalar_lea.hbm %s488_s1, 128 }
  0x14   :  { %s33_s24 = sshll.u32 %s364_s23, 4  ;;  %p312_p8 = scmp.ne.s32.totalorder %s488_s1, %s311_s27  ;;  %s34_s24 = int_to_ptr.vmem [resolvable:$true] %s33_s24 }
  0x15   :  { %p315_p9 = scmp.lt.u32.totalorder %s311_s27, %s488_s1 }
  0x17   :  { %p317_p10 = pnand %p315_p9, %p312_p8 }
  0x19   :  { %320 = shalt.err (!%p317_p10)
}
  0x1a   :  { %s321_s4 = scalar_lea.vmem %s34_s24, 128  ;;  %p326_p12 = scmp.lt.s32.totalorder %s34_s24, %s34_s24 }
  0x1b   :  { %p322_p11 = scmp.ne.s32.totalorder %s34_s24, %s321_s4  ;;  %p327_p13 = scmp.lt.s32.totalorder %s321_s4, %s321_s4 }
  0x1d   :  { %p328_p0 = por %p327_p13, %p326_p12 }
  0x1f   :  { %p329_p1 = pnand %p328_p0, %p322_p11 }
  0x21   :  { %332 = shalt.err (!%p329_p1)
}
  0x22   :  { %39 = dma.hbm_to_vmem [thread:$0]  %s488_s1, 128, %s34_s24, [#allocation6], %s362_s19, %s362_s19, %s363_s20  }
  0x23   :  { %355 = dma.done.wait [#allocation3], 128  }
  0x24   :  { %356 = vsyncadd [#allocation3], 4294967168 }
  0x25   :  { %357 = dma.done.wait [#allocation6], 128  }
  0x26   :  { %358 = vsyncadd [#allocation6], 4294967168  ;;  %v365_v0 = vmov 0.0   ;;  %vm72_vm0 = vcmask 1041408   ;;  %v56_v1 = vld [vmem:[#allocation2] sm:$0x3] }
  0x27   :  { %52 = vst [vmem:[#allocation7] sm:$0xf] %v365_v0  ;;  %53 = vst [vmem:[#allocation7 + $0x4] sm:$0xf] %v365_v0  ;;  %v57_v2 = vld [vmem:[#allocation2 + $0x2] sm:$0x3]  ;;  %v414_v7 = vmul.f32 %v56_v1, %v56_v1 }
  0x28   :  { %54 = vst [vmem:[#allocation7 + $0x8] sm:$0xf] %v365_v0  ;;  %55 = vst [vmem:[#allocation7 + $0xc] sm:$0xf] %v365_v0  ;;  %v58_v3 = vld [vmem:[#allocation2 + $0x4] sm:$0x3]  ;;  %v416_v8 = vmul.f32 %v57_v2, %v57_v2 }
  0x29   :  { %v408_v4 = vld [vmem:[#allocation2 + $0x6] sm:$0x3]  ;;  %v410_v5 = vld [vmem:[#allocation5] sm:$0x3]  ;;  %v412_v6 = vld [vmem:[#allocation5 + $0x2] sm:$0x3]  ;;  %v418_v9 = vmul.f32 %v58_v3, %v58_v3 }
  0x2a   :  { %v420_v10 = vld [vmem:[#allocation5 + $0x4] sm:$0x3]  ;;  %v422_v11 = vld [vmem:[#allocation5 + $0x6] sm:$0x3]  ;;  %v64_v12 = vsub.f32 %v56_v1, %v410_v5  ;;  %v65_v13 = vsub.f32 %v57_v2, %v412_v6  ;;  %v105_v14 = vmul.f32 %v410_v5, %v56_v1  ;;  %v106_v15 = vmul.f32 %v412_v6, %v57_v2  ;;  %s366_s1 = smov [#allocation7]  }
  0x2b   :  { %v66_v16 = vsub.f32 %v58_v3, %v420_v10  ;;  %v67_v17 = vsub.f32 %v408_v4, %v422_v11  ;;  %v107_v18 = vmul.f32 %v420_v10, %v58_v3  ;;  %v108_v19 = vmul.f32 %v422_v11, %v408_v4  ;;  %s268_s6 = sshll.u32 %s366_s1, 4  ;;  %s269_s6 = int_to_ptr.vmem [resolvable:$true] %s268_s6 }
  0x2c   :  { %v68_v20 = vmul.f32 %v64_v12, %v64_v12  ;;  %v69_v21 = vmul.f32 %v65_v13, %v65_v13  ;;  %v109_v22 = vsel %vm72_vm0, %v105_v14, 0.0  ;;  %v116_v23 = vsel %vm72_vm0, %v106_v15, 0.0  ;;  %s333_s7 = scalar_lea.vmem %s269_s6, 256  ;;  %p338_p3 = scmp.lt.s32.totalorder %s269_s6, %s269_s6 }
  0x2d   :  { %v70_v24 = vmul.f32 %v66_v16, %v66_v16  ;;  %v71_v25 = vmul.f32 %v67_v17, %v67_v17  ;;  %v110_v26 = vrot.slane %v109_v22, 4  ;;  %v117_v27 = vrot.slane %v116_v23, 4  ;;  %p334_p2 = scmp.ne.s32.totalorder %s269_s6, %s333_s7  ;;  %p339_p4 = scmp.lt.s32.totalorder %s333_s7, %s333_s7 }
  0x2e   :  { %v73_v28 = vsel %vm72_vm0, %v68_v20, 0.0  ;;  %v80_v29 = vsel %vm72_vm0, %v69_v21, 0.0  ;;  %v123_v30 = vsel %vm72_vm0, %v107_v18, 0.0  ;;  %v130_v31 = vsel %vm72_vm0, %v108_v19, 0.0 }
  0x2f   :  { %v74_v32 = vrot.slane %v73_v28, 4  ;;  %v81_v33 = vrot.slane %v80_v29, 4  ;;  %v87_v34 = vsel %vm72_vm0, %v70_v24, 0.0  ;;  %v94_v35 = vsel %vm72_vm0, %v71_v25, 0.0  ;;  %v213_v24 = vld [vmem:[#allocation7] sm:$0xf]  ;;  %p340_p5 = por %p339_p4, %p338_p3 }
  0x30   :  { %vm218_vm1 = vcmask 1041409   ;;  %v88_v36 = vrot.slane %v87_v34, 4  ;;  %v95_v37 = vrot.slane %v94_v35, 4  ;;  %v111_v38 = vadd.f32 %v110_v26, %v109_v22 }
  0x31   :  { %v118_v39 = vadd.f32 %v117_v27, %v116_v23  ;;  %v75_v40 = vadd.f32 %v74_v32, %v73_v28  ;;  %v82_v41 = vadd.f32 %v81_v33, %v80_v29  ;;  %vm220_vm2 = vcmask 1042434   ;;  %p341_p6 = pnand %p340_p5, %p334_p2 }
  0x32   :  { %v124_v42 = vrot.slane %v123_v30, 4  ;;  %v131_v43 = vrot.slane %v130_v31, 4  ;;  %v89_v44 = vadd.f32 %v88_v36, %v87_v34  ;;  %v96_v45 = vadd.f32 %v95_v37, %v94_v35 }
  0x33   :  { %vm222_vm3 = vcmask 1043459   ;;  %v112_v46 = vrot.slane %v111_v38, 2  ;;  %v119_v47 = vrot.slane %v118_v39, 2  ;;  %v76_v48 = vrot.slane %v75_v40, 2 }
  0x34   :  { %v83_v49 = vrot.slane %v82_v41, 2  ;;  %v125_v50 = vadd.f32 %v124_v42, %v123_v30  ;;  %v132_v51 = vadd.f32 %v131_v43, %v130_v31  ;;  %v90_v52 = vrot.slane %v89_v44, 2  ;;  %v228_v30 = vld [vmem:[#allocation7 + $0x4] sm:$0xf] }
  0x35   :  { %v97_v53 = vrot.slane %v96_v45, 2  ;;  %v113_v54 = vadd.f32 %v112_v46, %v111_v38  ;;  %v120_v55 = vadd.f32 %v119_v47, %v118_v39  ;;  %v77_v56 = vadd.f32 %v76_v48, %v75_v40 }
  0x36   :  { %v84_v57 = vadd.f32 %v83_v49, %v82_v41  ;;  %v126_v58 = vrot.slane %v125_v50, 2  ;;  %v133_v59 = vrot.slane %v132_v51, 2  ;;  %v91_v60 = vadd.f32 %v90_v52, %v89_v44 }
  0x37   :  { %v98_v61 = vadd.f32 %v97_v53, %v96_v45  ;;  %v114_v62 = vrot.slane %v113_v54, 1  ;;  %v121_v63 = vrot.slane %v120_v55, 1  ;;  %v78_v0 = vrot.slane %v77_v56, 1 }
  0x38   :  { %v85_v1 = vrot.slane %v84_v57, 1  ;;  %v127_v2 = vadd.f32 %v126_v58, %v125_v50  ;;  %v134_v3 = vadd.f32 %v133_v59, %v132_v51  ;;  %v92_v12 = vrot.slane %v91_v60, 1 }
  0x39   :  { %v99_v13 = vrot.slane %v98_v61, 1  ;;  %v115_v14 = vadd.f32 %v114_v62, %v113_v54  ;;  %v122_v15 = vadd.f32 %v121_v63, %v120_v55  ;;  %v79_v16 = vadd.f32 %v78_v0, %v77_v56 }
  0x3a   :  { %v86_v17 = vadd.f32 %v85_v1, %v84_v57  ;;  %v128_v18 = vrot.slane %v127_v2, 1  ;;  %v135_v19 = vrot.slane %v134_v3, 1  ;;  %v93_v20 = vadd.f32 %v92_v12, %v91_v60 }
  0x3b   :  { %v100_v21 = vadd.f32 %v99_v13, %v98_v61  ;;  %v233_v22 = vsel %vm218_vm1, %v122_v15, %v115_v14  ;;  %v144_v23 = vmul.f32 %v408_v4, %v408_v4  ;;  %v145_v28 = vsel %vm72_vm0, %v414_v7, 0.0 }
  0x3c   :  { %v219_v25 = vsel %vm218_vm1, %v86_v17, %v79_v16  ;;  %v129_v26 = vadd.f32 %v128_v18, %v127_v2  ;;  %v136_v27 = vadd.f32 %v135_v19, %v134_v3  ;;  %v146_v31 = vrot.slane %v145_v28, 4  ;;  %v240_v18 = vld [vmem:[#allocation7 + $0x8] sm:$0xf] }
  0x3d   :  { %v221_v29 = vsel %vm220_vm2, %v93_v20, %v219_v25  ;;  %v152_v32 = vsel %vm72_vm0, %v416_v8, 0.0  ;;  %v159_v33 = vsel %vm72_vm0, %v418_v9, 0.0  ;;  %v166_v39 = vsel %vm72_vm0, %v144_v23, 0.0 }
  0x3e   :  { %v223_v4 = vsel %vm222_vm3, %v100_v21, %v221_v29  ;;  %v234_v34 = vsel %vm220_vm2, %v129_v26, %v233_v22  ;;  %v153_v35 = vrot.slane %v152_v32, 4  ;;  %v160_v36 = vrot.slane %v159_v33, 4 }
  0x3f   :  { %v225_v37 = vadd.f32 %v223_v4, %v213_v24  ;;  %v235_v38 = vsel %vm222_vm3, %v136_v27, %v234_v34  ;;  %v147_v7 = vadd.f32 %v146_v31, %v145_v28  ;;  %v167_v43 = vrot.slane %v166_v39, 4 }
  0x40   :  { %v237_v40 = vadd.f32 %v235_v38, %v228_v30  ;;  %v154_v41 = vadd.f32 %v153_v35, %v152_v32  ;;  %v161_v42 = vadd.f32 %v160_v36, %v159_v33  ;;  %v177_v9 = vmul.f32 %v410_v5, %v410_v5  ;;  %v252_v35 = vld [vmem:[#allocation7 + $0xc] sm:$0xf] }
  0x41   :  { %226 = vst [vmem:[#allocation7] sm:$0xf] %v225_v37  ;;  %v148_v8 = vrot.slane %v147_v7, 2  ;;  %v178_v44 = vmul.f32 %v412_v6, %v412_v6  ;;  %v179_v45 = vmul.f32 %v420_v10, %v420_v10  ;;  %v168_v48 = vadd.f32 %v167_v43, %v166_v39 }
  0x42   :  { %238 = vst [vmem:[#allocation7 + $0x4] sm:$0xf] %v237_v40  ;;  %v155_v46 = vrot.slane %v154_v41, 2  ;;  %v162_v47 = vrot.slane %v161_v42, 2  ;;  %v180_v49 = vmul.f32 %v422_v11, %v422_v11  ;;  %v181_v51 = vsel %vm72_vm0, %v177_v9, 0.0 }
  0x43   :  { %v149_v50 = vadd.f32 %v148_v8, %v147_v7  ;;  %v188_v52 = vsel %vm72_vm0, %v178_v44, 0.0  ;;  %v195_v5 = vsel %vm72_vm0, %v179_v45, 0.0  ;;  %v169_v6 = vrot.slane %v168_v48, 2 }
  0x44   :  { %v156_v53 = vadd.f32 %v155_v46, %v154_v41  ;;  %v163_v54 = vadd.f32 %v162_v47, %v161_v42  ;;  %v182_v55 = vrot.slane %v181_v51, 4  ;;  %v189_v10 = vrot.slane %v188_v52, 4 }
  0x45   :  { %v150_v56 = vrot.slane %v149_v50, 1  ;;  %v196_v57 = vrot.slane %v195_v5, 4  ;;  %v202_v58 = vsel %vm72_vm0, %v180_v49, 0.0  ;;  %v170_v61 = vadd.f32 %v169_v6, %v168_v48 }
  0x46   :  { %v157_v59 = vrot.slane %v156_v53, 1  ;;  %v164_v60 = vrot.slane %v163_v54, 1  ;;  %v183_v11 = vadd.f32 %v182_v55, %v181_v51  ;;  %v190_v63 = vadd.f32 %v189_v10, %v188_v52 }
  0x47   :  { %v151_v62 = vadd.f32 %v150_v56, %v149_v50  ;;  %v197_v0 = vadd.f32 %v196_v57, %v195_v5  ;;  %v203_v1 = vrot.slane %v202_v58, 4  ;;  %v171_v12 = vrot.slane %v170_v61, 1 }
  0x48   :  { %v158_v2 = vadd.f32 %v157_v59, %v156_v53  ;;  %v165_v3 = vadd.f32 %v164_v60, %v163_v54  ;;  %v184_v13 = vrot.slane %v183_v11, 2  ;;  %v191_v14 = vrot.slane %v190_v63, 2 }
  0x49   :  { %v198_v15 = vrot.slane %v197_v0, 2  ;;  %v204_v16 = vadd.f32 %v203_v1, %v202_v58  ;;  %v172_v17 = vadd.f32 %v171_v12, %v170_v61 }
  0x4a   :  { %v245_v19 = vsel %vm218_vm1, %v158_v2, %v151_v62  ;;  %v185_v20 = vadd.f32 %v184_v13, %v183_v11  ;;  %v192_v22 = vadd.f32 %v191_v14, %v190_v63 }
  0x4b   :  { %v246_v21 = vsel %vm220_vm2, %v165_v3, %v245_v19  ;;  %v199_v23 = vadd.f32 %v198_v15, %v197_v0  ;;  %v205_v24 = vrot.slane %v204_v16, 2 }
  0x4c   :  { %v247_v25 = vsel %vm222_vm3, %v172_v17, %v246_v21  ;;  %v186_v26 = vrot.slane %v185_v20, 1  ;;  %v193_v28 = vrot.slane %v192_v22, 1 }
  0x4d   :  { %v249_v27 = vadd.f32 %v247_v25, %v240_v18  ;;  %v200_v29 = vrot.slane %v199_v23, 1  ;;  %v206_v30 = vadd.f32 %v205_v24, %v204_v16 }
  0x4e   :  { %v187_v31 = vadd.f32 %v186_v26, %v185_v20  ;;  %v194_v32 = vadd.f32 %v193_v28, %v192_v22 }
  0x4f   :  { %250 = vst [vmem:[#allocation7 + $0x8] sm:$0xf] %v249_v27  ;;  %v201_v33 = vadd.f32 %v200_v29, %v199_v23  ;;  %v207_v4 = vrot.slane %v206_v30, 1 }
  0x50   :  { %v257_v36 = vsel %vm218_vm1, %v194_v32, %v187_v31 }
  0x51   :  { %v208_v34 = vadd.f32 %v207_v4, %v206_v30  ;;  %v258_v37 = vsel %vm220_vm2, %v201_v33, %v257_v36 }
  0x53   :  { %v259_v38 = vsel %vm222_vm3, %v208_v34, %v258_v37 }
  0x54   :  { %v261_v7 = vadd.f32 %v259_v38, %v252_v35 }
  0x56   :  { %262 = vst [vmem:[#allocation7 + $0xc] sm:$0xf] %v261_v7 }
  0x57   :  { %344 = shalt.err (!%p341_p6)
}
  0x58   :  { %s345_s10 = scalar_lea.hbm %s489_s2, 256 }
  0x59   :  { %p346_p7 = scmp.ne.s32.totalorder %s489_s2, %s345_s10  ;;  %p349_p8 = scmp.lt.u32.totalorder %s345_s10, %s489_s2 }
  0x5b   :  { %p351_p9 = pnand %p349_p8, %p346_p7 }
  0x5d   :  { %354 = shalt.err (!%p351_p9)
}
  0x5e   :  { %s367_s15 = smov 64   ;;  %s368_s16 = smov 4  }
  0x5f   :  { %274 = dma.vmem_to_hbm [thread:$0]  %s269_s6, 256, %s489_s2, [#allocation4], %s367_s15, %s367_s15, %s368_s16  }
  0x60   :  { %359 = dma.done.wait [#allocation4], 256  }
  0x61   :  { %360 = vsyncadd [#allocation4], 4294967040 }
  0x62   :  { %278 = vsyncpa [#allocation3], 1 }
  0x63   :  { %279 = vsyncpa [#allocation6], 1 }
  0x64   :  { %280 = vsyncpa [#allocation4], 1 }

</bundles_post_ra>
